<compile_context>
chip_gen: v7x
topology: tpu7x:2x2x1
jax: 0.10.0
libtpu: 0.0.40
codegen_flags: <defaults>
</compile_context>

<pallas_src>
import jax
import jax.numpy as jnp
from jax.experimental import pallas as pl
from jax.experimental.pallas import tpu as pltpu


def residual_kernel(x_ref, w1_ref, w2_ref, o_ref):
    # x_ref  : (N, Cin, L)     whole batch, NCL (PyTorch layout), f32
    # w1_ref : (Cres, 3*Cin)   k=3 conv taps fused column-wise [k0 | k1 | k2], bf16
    # w2_ref : (Chid, Cres)    k=1 conv, bf16
    # o_ref  : (N, Chid, L)    f32
    n_batch, cin, length = x_ref.shape
    nl = n_batch * length
    mxu_dtype = w1_ref.dtype

    # ---- fold batch into lanes: one (Cin, N*L) slab --------------------------
    x = jnp.concatenate([x_ref[n] for n in range(n_batch)], axis=1)   # (Cin, NL)
    xr = jnp.maximum(x, 0.0)                                          # ReLU(x)

    # padding=1 taps: k=0 sees x[:, l-1], k=1 sees x[:, l], k=2 sees x[:, l+1].
    # Shift the whole folded slab by one lane and zero the batch-seam columns.
    lane = jax.lax.broadcasted_iota(jnp.int32, (cin, nl), 1)
    zcol = jnp.zeros((cin, 1), dtype=xr.dtype)
    x_m1 = jnp.concatenate([zcol, xr[:, : nl - 1]], axis=1)
    x_m1 = jnp.where(lane % length == 0, 0.0, x_m1)
    x_p1 = jnp.concatenate([xr[:, 1:], zcol], axis=1)
    x_p1 = jnp.where(lane % length == length - 1, 0.0, x_p1)

    xcat = jnp.concatenate([x_m1, xr, x_p1], axis=0)                  # (3*Cin, NL)

    # ---- two MXU matmuls for the whole batch (bf16 operands, f32 accum) -----
    h = jnp.dot(w1_ref[...], xcat.astype(mxu_dtype),
                preferred_element_type=jnp.float32)                   # (Cres, NL)
    hr = jnp.maximum(h, 0.0)                                          # ReLU
    y = jnp.dot(w2_ref[...], hr.astype(mxu_dtype),
                preferred_element_type=jnp.float32)                   # (Chid, NL)

    out = x + y                                                       # residual (pre-ReLU x)

    # ---- one lane-dense store of the whole (N, Chid, L) block ---------------
    o_ref[...] = jnp.stack(
        [out[:, n * length:(n + 1) * length] for n in range(n_batch)],
        axis=0).astype(o_ref.dtype)


def pack_residual_weights(w1, w2, mxu_dtype=jnp.bfloat16):
    """One-time weight prep (call at parameter-init time, not per forward).

    w1: (Cres, Cin, 3) PyTorch Conv1d weight -> (Cres, 3*Cin) with
        w1cat[:, k*Cin + i] == w1[:, i, k]   (matches [x[l-1] | x[l] | x[l+1]])
    w2: (Chid, Cres, 1) -> (Chid, Cres)
    """
    cres, cin, k = w1.shape
    w1cat = jnp.transpose(w1, (0, 2, 1)).reshape(cres, k * cin).astype(mxu_dtype)
    w2m = w2[:, :, 0].astype(mxu_dtype)
    return w1cat, w2m


def residual_forward(x_ncl, w1cat, w2m):
    """x_ncl: (N, Cin, L) as in PyTorch.  w1cat/w2m: pre-packed bf16 weights."""
    n, cin, length = x_ncl.shape
    chid = w2m.shape[0]

    return pl.pallas_call(
        residual_kernel,
        out_shape=jax.ShapeDtypeStruct((n, chid, length), x_ncl.dtype),
        grid_spec=pltpu.PrefetchScalarGridSpec(
            num_scalar_prefetch=0,
            grid=(1,),                                       # single step: whole batch
            in_specs=[
                pl.BlockSpec((n, cin, length), lambda i: (0, 0, 0)),
                pl.BlockSpec(w1cat.shape, lambda i: (0, 0)),
                pl.BlockSpec(w2m.shape, lambda i: (0, 0)),
            ],
            out_specs=pl.BlockSpec((n, chid, length), lambda i: (0, 0, 0)),
        ),
        compiler_params=pltpu.CompilerParams(
            dimension_semantics=("arbitrary",)),
    )(x_ncl, w1cat, w2m)


def reference_forward(x_ncl, w1, w2):
    """Pure-JAX f32 reference using lax conv (NCL layout, same as PyTorch)."""
    xr = jnp.maximum(x_ncl, 0.0)
    h = jax.lax.conv_general_dilated(
        xr, w1, window_strides=(1,), padding=((1, 1),),
        dimension_numbers=("NCH", "OIH", "NCH"))
    hr = jnp.maximum(h, 0.0)
    y = jax.lax.conv_general_dilated(
        hr, w2, window_strides=(1,), padding=((0, 0),),
        dimension_numbers=("NCH", "OIH", "NCH"))
    return x_ncl + y


if __name__ == "__main__":
    # Small shapes consistent with the module:
    #   in_channels == num_hiddens (needed for the residual add), kernels 3 and 1.
    batch = 2
    in_channels = 32        # == num_hiddens
    num_hiddens = 32
    num_residual_hiddens = 16
    length = 16

    key = jax.random.PRNGKey(0)
    kx, kw1, kw2 = jax.random.split(key, 3)

    x = jax.random.normal(kx, (batch, in_channels, length), dtype=jnp.float32)
    # PyTorch Conv1d weight shapes: (out_channels, in_channels, kernel_size)
    w1 = (jax.random.normal(kw1, (num_residual_hiddens, in_channels, 3),
                            dtype=jnp.float32) * 0.1)
    w2 = (jax.random.normal(kw2, (num_hiddens, num_residual_hiddens, 1),
                            dtype=jnp.float32) * 0.1)

    # One-time weight prep (hoisted out of the per-call path).
    w1cat, w2m = pack_residual_weights(w1, w2)

    fwd = jax.jit(residual_forward)
    out = fwd(x, w1cat, w2m)
    out = jax.block_until_ready(out)

    ref = reference_forward(x, w1, w2)
    assert out.shape == (batch, num_hiddens, length)
    # bf16 MXU operands -> compare against the f32 conv reference with a
    # bf16-appropriate tolerance.
    assert jnp.allclose(out, ref, atol=5e-2, rtol=5e-2), "mismatch vs reference"

    print("KERNEL_OK")
</pallas_src>

<mosaic_0001>
module attributes {stable_mosaic.version = 11 : i64} {
  func.func @residual_kernel(%arg0: i32, %arg1: memref<2x32x16xf32, #tpu.memory_space<vmem>>, %arg2: memref<16x96xbf16, #tpu.memory_space<vmem>>, %arg3: memref<32x16xbf16, #tpu.memory_space<vmem>>, %arg4: memref<2x32x16xf32, #tpu.memory_space<vmem>>) attributes {dimension_semantics = [#tpu.dimension_semantics<arbitrary>], iteration_bounds = array<i64: 1>, scalar_prefetch = 0 : i64, scratch_operands = 0 : i64, tpu.core_type = #tpu.core_type<tc>, window_params = [{pipeline_mode = #tpu.pipeline_mode<synchronous>, transform_indices = @transform_0, window_bounds = array<i64: 2, 32, 16>}, {pipeline_mode = #tpu.pipeline_mode<synchronous>, transform_indices = @transform_1, window_bounds = array<i64: 16, 96>}, {pipeline_mode = #tpu.pipeline_mode<synchronous>, transform_indices = @transform_2, window_bounds = array<i64: 32, 16>}, {pipeline_mode = #tpu.pipeline_mode<synchronous>, transform_indices = @transform_3, window_bounds = array<i64: 2, 32, 16>}]} {
    %c0 = arith.constant 0 : index
    %c0_0 = arith.constant 0 : index
    %c0_1 = arith.constant 0 : index
    %0 = vector.load %arg1[%c0, %c0_0, %c0_1] : memref<2x32x16xf32, #tpu.memory_space<vmem>>, vector<1x32x16xf32>
    %1 = vector.shape_cast %0 : vector<1x32x16xf32> to vector<32x16xf32>
    %c1 = arith.constant 1 : index
    %c0_2 = arith.constant 0 : index
    %c0_3 = arith.constant 0 : index
    %2 = vector.load %arg1[%c1, %c0_2, %c0_3] : memref<2x32x16xf32, #tpu.memory_space<vmem>>, vector<1x32x16xf32>
    %3 = vector.shape_cast %2 : vector<1x32x16xf32> to vector<32x16xf32>
    %4 = tpu.concatenate %1, %3 in 1 : vector<32x16xf32>, vector<32x16xf32> -> vector<32x32xf32>
    %cst = arith.constant 0.000000e+00 : f32
    %5 = vector.broadcast %cst : f32 to vector<32x32xf32>
    %6 = arith.maximumf %4, %5 : vector<32x32xf32>
    %7 = tpu.iota {dimensions = array<i32: 1>} : vector<32x32xi32>
    %cst_4 = arith.constant 0.000000e+00 : f32
    %8 = vector.broadcast %cst_4 : f32 to vector<32x1xf32>
    %9 = vector.extract_strided_slice %6 {offsets = [0, 0], sizes = [32, 31], strides = [1, 1]} : vector<32x32xf32> to vector<32x31xf32>
    %10 = tpu.concatenate %8, %9 in 1 : vector<32x1xf32>, vector<32x31xf32> -> vector<32x32xf32>
    %c16_i32 = arith.constant 16 : i32
    %c0_i32 = arith.constant 0 : i32
    %11 = arith.cmpi eq, %c16_i32, %c0_i32 : i32
    %c1_i32 = arith.constant 1 : i32
    %12 = arith.select %11, %c1_i32, %c16_i32 : i32
    %13 = vector.broadcast %12 : i32 to vector<32x32xi32>
    %14 = arith.remsi %7, %13 : vector<32x32xi32>
    %c0_i32_5 = arith.constant 0 : i32
    %15 = vector.broadcast %c0_i32_5 : i32 to vector<32x32xi32>
    %16 = arith.cmpi ne, %14, %15 : vector<32x32xi32>
    %c0_i32_6 = arith.constant 0 : i32
    %17 = vector.broadcast %c0_i32_6 : i32 to vector<32x32xi32>
    %18 = arith.cmpi slt, %14, %17 : vector<32x32xi32>
    %c0_i32_7 = arith.constant 0 : i32
    %19 = arith.cmpi slt, %12, %c0_i32_7 : i32
    %20 = vector.broadcast %19 : i1 to vector<32x32xi1>
    %21 = vector.broadcast %20 : vector<32x32xi1> to vector<32x32xi1>
    %22 = arith.xori %18, %21 : vector<32x32xi1>
    %23 = arith.andi %22, %16 : vector<32x32xi1>
    %24 = vector.broadcast %12 : i32 to vector<32x32xi32>
    %25 = arith.addi %14, %24 : vector<32x32xi32>
    %26 = arith.select %23, %25, %14 : vector<32x32xi1>, vector<32x32xi32>
    %c0_i32_8 = arith.constant 0 : i32
    %27 = vector.broadcast %c0_i32_8 : i32 to vector<32x32xi32>
    %28 = arith.cmpi eq, %26, %27 : vector<32x32xi32>
    %cst_9 = arith.constant 0.000000e+00 : f32
    %29 = vector.broadcast %cst_9 : f32 to vector<32x32xf32>
    %30 = arith.select %28, %29, %10 : vector<32x32xi1>, vector<32x32xf32>
    %31 = vector.extract_strided_slice %6 {offsets = [0, 1], sizes = [32, 31], strides = [1, 1]} : vector<32x32xf32> to vector<32x31xf32>
    %32 = tpu.concatenate %31, %8 in 1 : vector<32x31xf32>, vector<32x1xf32> -> vector<32x32xf32>
    %c16_i32_10 = arith.constant 16 : i32
    %c0_i32_11 = arith.constant 0 : i32
    %33 = arith.cmpi eq, %c16_i32_10, %c0_i32_11 : i32
    %c1_i32_12 = arith.constant 1 : i32
    %34 = arith.select %33, %c1_i32_12, %c16_i32_10 : i32
    %35 = vector.broadcast %34 : i32 to vector<32x32xi32>
    %36 = arith.remsi %7, %35 : vector<32x32xi32>
    %c0_i32_13 = arith.constant 0 : i32
    %37 = vector.broadcast %c0_i32_13 : i32 to vector<32x32xi32>
    %38 = arith.cmpi ne, %36, %37 : vector<32x32xi32>
    %c0_i32_14 = arith.constant 0 : i32
    %39 = vector.broadcast %c0_i32_14 : i32 to vector<32x32xi32>
    %40 = arith.cmpi slt, %36, %39 : vector<32x32xi32>
    %c0_i32_15 = arith.constant 0 : i32
    %41 = arith.cmpi slt, %34, %c0_i32_15 : i32
    %42 = vector.broadcast %41 : i1 to vector<32x32xi1>
    %43 = vector.broadcast %42 : vector<32x32xi1> to vector<32x32xi1>
    %44 = arith.xori %40, %43 : vector<32x32xi1>
    %45 = arith.andi %44, %38 : vector<32x32xi1>
    %46 = vector.broadcast %34 : i32 to vector<32x32xi32>
    %47 = arith.addi %36, %46 : vector<32x32xi32>
    %48 = arith.select %45, %47, %36 : vector<32x32xi1>, vector<32x32xi32>
    %c15_i32 = arith.constant 15 : i32
    %49 = vector.broadcast %c15_i32 : i32 to vector<32x32xi32>
    %50 = arith.cmpi eq, %48, %49 : vector<32x32xi32>
    %cst_16 = arith.constant 0.000000e+00 : f32
    %51 = vector.broadcast %cst_16 : f32 to vector<32x32xf32>
    %52 = arith.select %50, %51, %32 : vector<32x32xi1>, vector<32x32xf32>
    %53 = tpu.concatenate %30, %6, %52 in 0 : vector<32x32xf32>, vector<32x32xf32>, vector<32x32xf32> -> vector<96x32xf32>
    %c0_17 = arith.constant 0 : index
    %c0_18 = arith.constant 0 : index
    %54 = vector.load %arg2[%c0_17, %c0_18] : memref<16x96xbf16, #tpu.memory_space<vmem>>, vector<16x96xbf16>
    %55 = arith.truncf %53 : vector<96x32xf32> to vector<96x32xbf16>
    %cst_19 = arith.constant dense<0.000000e+00> : vector<16x32xf32>
    %56 = tpu.matmul %54, %55, %cst_19 {dimension_numbers = #tpu.dot_dimension_numbers<[1], [0], [0], [1], [0, 0, 1, 1], [], []>} : vector<16x96xbf16>, vector<96x32xbf16>, vector<16x32xf32> -> vector<16x32xf32>
    %cst_20 = arith.constant 0.000000e+00 : f32
    %57 = vector.broadcast %cst_20 : f32 to vector<16x32xf32>
    %58 = arith.maximumf %56, %57 : vector<16x32xf32>
    %c0_21 = arith.constant 0 : index
    %c0_22 = arith.constant 0 : index
    %59 = vector.load %arg3[%c0_21, %c0_22] : memref<32x16xbf16, #tpu.memory_space<vmem>>, vector<32x16xbf16>
    %60 = arith.truncf %58 : vector<16x32xf32> to vector<16x32xbf16>
    %cst_23 = arith.constant dense<0.000000e+00> : vector<32x32xf32>
    %61 = tpu.matmul %59, %60, %cst_23 {dimension_numbers = #tpu.dot_dimension_numbers<[1], [0], [0], [1], [0, 0, 1, 1], [], []>} : vector<32x16xbf16>, vector<16x32xbf16>, vector<32x32xf32> -> vector<32x32xf32>
    %62 = arith.addf %4, %61 : vector<32x32xf32>
    %63 = vector.extract_strided_slice %62 {offsets = [0, 0], sizes = [32, 16], strides = [1, 1]} : vector<32x32xf32> to vector<32x16xf32>
    %64 = vector.extract_strided_slice %62 {offsets = [0, 16], sizes = [32, 16], strides = [1, 1]} : vector<32x32xf32> to vector<32x16xf32>
    %65 = vector.shape_cast %63 : vector<32x16xf32> to vector<1x32x16xf32>
    %66 = vector.shape_cast %64 : vector<32x16xf32> to vector<1x32x16xf32>
    %67 = tpu.concatenate %65, %66 in 0 : vector<1x32x16xf32>, vector<1x32x16xf32> -> vector<2x32x16xf32>
    %c0_24 = arith.constant 0 : index
    %c0_25 = arith.constant 0 : index
    %c0_26 = arith.constant 0 : index
    %68 = vector.load %arg4[%c0_24, %c0_25, %c0_26] : memref<2x32x16xf32, #tpu.memory_space<vmem>>, vector<2x32x16xf32>
    tpu.vector_store %arg4[%c0_24, %c0_25, %c0_26], %67 {strides = array<i32>} : memref<2x32x16xf32, #tpu.memory_space<vmem>>, vector<2x32x16xf32>,
    return
  }
  func.func @transform_0(%arg0: i32) -> (i32, i32, i32) {
    %c0_i32 = arith.constant 0 : i32
    %c0_i32_0 = arith.constant 0 : i32
    %c0_i32_1 = arith.constant 0 : i32
    %c0_i32_2 = arith.constant 0 : i32
    return %c0_i32, %c0_i32_0, %c0_i32_1 : i32, i32, i32
  }
  func.func @transform_1(%arg0: i32) -> (i32, i32) {
    %c0_i32 = arith.constant 0 : i32
    %c0_i32_0 = arith.constant 0 : i32
    %c0_i32_1 = arith.constant 0 : i32
    return %c0_i32, %c0_i32_0 : i32, i32
  }
  func.func @transform_2(%arg0: i32) -> (i32, i32) {
    %c0_i32 = arith.constant 0 : i32
    %c0_i32_0 = arith.constant 0 : i32
    %c0_i32_1 = arith.constant 0 : i32
    return %c0_i32, %c0_i32_0 : i32, i32
  }
  func.func @transform_3(%arg0: i32) -> (i32, i32, i32) {
    %c0_i32 = arith.constant 0 : i32
    %c0_i32_0 = arith.constant 0 : i32
    %c0_i32_1 = arith.constant 0 : i32
    %c0_i32_2 = arith.constant 0 : i32
    return %c0_i32, %c0_i32_0, %c0_i32_1 : i32, i32, i32
  }
}

</mosaic_0001>

<bundles_post_ra>
// kernel: residual_forward.1
= control target key start
LH: loop header
LB: loop body
LE: loop exit
PB: predicated region body
PF: predicated region fallthrough
CT: control target
= control target key end

     0   :  { %s366_s16 = smov 16   ;;  %vm40_vm0 = vcmask 130048   ;;  %v367_v9 = vmov 0.0   ;;  %s369_s29 = smov 127   ;;  %vm370_vm1 = vmmov 0   ;;  %v49_v25 = vlaneseq  ;;  %s500_s0 = inlined_call_operand.vmem [shape: f32[2,32,16], index: 0, kind: input, shape index: {}]   ;;  %s501_s1 = inlined_call_operand.vmem [shape: bf16[16,96], index: 1, kind: input, shape index: {}]   ;;  %s502_s2 = inlined_call_operand.vmem [shape: bf16[32,16], index: 2, kind: input, shape index: {}]   ;;  %s503_s3 = inlined_call_operand.vmem [shape: f32[2,32,16], index: 3, kind: output, shape index: {}]  }
   0x1   :  { %v275_v0 = vld [vmem:[%s500_s0 + $0x30] sm:$0xff]  ;;  %v273_v1 = vld [vmem:[%s500_s0 + $0x20] sm:$0xff]  ;;  %v276_v2 = vld [vmem:[%s500_s0 + $0x38] sm:$0xff]  ;;  %315 = vmatprep.subr.bf16.mxu0 %v367_v9  ;;  %327 = vmatprep.mubr.msk.bf16.mxu0 %vm370_vm1, %v367_v9  ;;  %vm67_vm2 = vcmask 7168   ;;  %vm101_vm5 = vcmask 252928   ;;  %vm124_vm8 = vcmask 785408  }
   0x2   :  { %32 = vrot.lane.b32.xlu1 %v275_v0, %s366_s16  ;;  %28 = vrot.lane.b32.xlu0 %v273_v1, %s366_s16  ;;  %v274_v3 = vld [vmem:[%s500_s0 + $0x28] sm:$0xff]  ;;  %v17_v4 = vld [vmem:[%s500_s0 + $0x10] sm:$0xff]  ;;  %v50_v26 = vand.u32 127, %v49_v25  ;;  %s371_s11 = smov 112  }
   0x3   :  { %v15_v7 = vld [vmem:[%s500_s0] sm:$0xff]  ;;  %v18_v10 = vld [vmem:[%s500_s0 + $0x18] sm:$0xff]  ;;  %v16_v11 = vld [vmem:[%s500_s0 + $0x8] sm:$0xff]  ;;  %s368_s0 = smov 1  }
   0x4   :  { %v76_v27 = vand.u32 15, %v50_v26  ;;  %v363_v54 = vld [vmem:[%s501_s1] sm:$0xff]   ;;  %v365_v63 = vld [vmem:[%s502_s2 + $0x8] sm:$0xff]  }
   0x5   :  { %v364_v55 = vld [vmem:[%s502_s2] sm:$0xff]  }
   0x6   :  { %34 = vrot.lane.b32.xlu1 %v276_v2, %s366_s16  ;;  %30 = vrot.lane.b32.xlu0 %v274_v3, %s366_s16  ;;  %vm434_vm3 = vcmp.ne.s32.totalorder %v76_v27, 0  ;;  %vm444_vm6 = vcmp.ne.s32.totalorder %v76_v27, 15 }
   0x7   :  { %vm280_vm4 = vmpackc.low %vm434_vm3, %vm434_vm3  ;;  %333 = vmatprep.mubr.msk.bf16.mxu1 %vm40_vm0, %v364_v55 }
   0x8   :  { %vm290_vm7 = vmpackc.low %vm444_vm6, %vm444_vm6 }
  0x74   :  { %v33_v5 = vpop.permute.xlu1 %32  ;;  %v29_v6 = vpop.permute.xlu0 %28 }
  0x75   :  { %v411_v8 = vsel %vm40_vm0, %v17_v4, %v33_v5  ;;  %v421_v12 = vsel %vm40_vm0, %v15_v7, %v29_v6 }
  0x76   :  { %v47_v13 = vmax.f32 %v411_v8, 0.0  ;;  %v45_v18 = vmax.f32 %v421_v12, 0.0 }
  0x78   :  { %v35_v14 = vpop.permute.xlu1 %34  ;;  %v31_v15 = vpop.permute.xlu0 %30 }
  0x79   :  { %v425_v16 = vsel %vm40_vm0, %v18_v10, %v35_v14  ;;  %v428_v17 = vsel %vm40_vm0, %v16_v11, %v31_v15 }
  0x7a   :  { %v48_v19 = vmax.f32 %v425_v16, 0.0  ;;  %v46_v20 = vmax.f32 %v428_v17, 0.0 }
  0x7c   :  { %v348_v21 = vpack.i.bf16 %v48_v19, %v47_v13  ;;  %v343_v22 = vpack.i.bf16 %v46_v20, %v45_v18  ;;  %v115_v23 = vpack.c.bf16 %v46_v20, %v45_v18  ;;  %v116_v24 = vpack.c.bf16 %v48_v19, %v47_v13 }
  0x7e   :  { %349 = vrot.lane.b32.xlu1 %v348_v21, %s368_s0  ;;  %344 = vrot.lane.b32.xlu0 %v343_v22, %s368_s0 }
  0x82   :  { %359 = vrot.lane.b32.xlu1 %v348_v21, %s369_s29  ;;  %354 = vrot.lane.b32.xlu0 %v343_v22, %s369_s29 }
  0xf0   :  { %v350_v28 = vpop.permute.xlu1 %349  ;;  %v345_v29 = vpop.permute.xlu0 %344 }
  0xf1   :  { %v352_v31 = vunpack.i.h.bf16 %v350_v28  ;;  %v351_v32 = vunpack.i.l.bf16 %v350_v28  ;;  %v347_v33 = vunpack.i.h.bf16 %v345_v29  ;;  %v346_v34 = vunpack.i.l.bf16 %v345_v29 }
  0xf3   :  { %v69_v35 = vsel %vm67_vm2, 0.0, %v347_v33  ;;  %v68_v36 = vsel %vm67_vm2, 0.0, %v346_v34  ;;  %v71_v38 = vsel %vm67_vm2, 0.0, %v352_v31  ;;  %v70_v39 = vsel %vm67_vm2, 0.0, %v351_v32 }
  0xf4   :  { %v281_v37 = vpack.c.bf16 %v69_v35, %v68_v36  ;;  %v286_v40 = vpack.c.bf16 %v71_v38, %v70_v39  ;;  %v355_v41 = vpop.permute.xlu0 %354  ;;  %v360_v44 = vpop.permute.xlu1 %359 }
  0xf5   :  { %v357_v42 = vunpack.i.h.bf16 %v355_v41  ;;  %v356_v43 = vunpack.i.l.bf16 %v355_v41  ;;  %v362_v46 = vunpack.i.h.bf16 %v360_v44  ;;  %v361_v47 = vunpack.i.l.bf16 %v360_v44 }
  0xf6   :  { %316 = vmatpush3.bf16.msk.msra.mxu0 %vm280_vm4, %v281_v37 }
  0xf7   :  { %317 = vmatprep.subr.bf16.mxu0 %v367_v9  ;;  %v103_v48 = vsel %vm101_vm5, %v357_v42, 0.0  ;;  %v102_v49 = vsel %vm101_vm5, %v356_v43, 0.0  ;;  %v105_v51 = vsel %vm101_vm5, %v362_v46, 0.0  ;;  %v104_v52 = vsel %vm101_vm5, %v361_v47, 0.0 }
  0xf8   :  { %v291_v50 = vpack.c.bf16 %v103_v48, %v102_v49  ;;  %v296_v53 = vpack.c.bf16 %v105_v51, %v104_v52 }
  0xfa   :  { %318 = vmatpush3.bf16.msk.msra.mxu0 %vm280_vm4, %v286_v40 }
  0xfb   :  { %319 = vmatprep.subr.bf16.mxu0 %v367_v9 }
  0xfe   :  { %320 = vmatpush3.bf16.msra.mxu0 %v115_v23 }
  0xff   :  { %321 = vmatprep.subr.bf16.mxu0 %v367_v9 }
 0x102   :  { %322 = vmatpush3.bf16.msra.mxu0 %v116_v24 }
 0x103   :  { %323 = vmatprep.subr.bf16.mxu0 %v367_v9 }
 0x106   :  { %324 = vmatpush3.bf16.msk.msra.mxu0 %vm290_vm7, %v291_v50 }
 0x107   :  { %325 = vmatprep.subr.bf16.mxu0 %v367_v9 }
 0x10a   :  { %326 = vmatpush3.bf16.msk.msra.mxu0 %vm290_vm7, %v296_v53 }
 0x10d   :  { %328 = vmatmul.mubr.msk.bf16.vlgmr.msra.gmra.mrb[0].mxu0 %vm124_vm8, %v363_v54 }
 0x1e0   :  { %v162_v56 = vpop.f32.mrb[0].mxu0 }
 0x1e1   :  { %v329_v57 = vpop.f32.mrb[1].mxu0  ;;  %v169_v59 = vmax.f32 %v162_v56, 0.0 }
 0x1e2   :  { %v165_v58 = vpop.f32.mrb[2].mxu0 }
 0x1e3   :  { %v170_v60 = vmax.f32 %v165_v58, 0.0  ;;  %v330_v61 = vpop.f32.mrb[3].mxu0 }
 0x1e5   :  { %v175_v62 = vpack.c.bf16 %v170_v60, %v169_v59 }
 0x1e7   :  { %331 = vmatprep.subr.bf16.mxu1 %v175_v62 }
 0x1e8   :  { %332 = vmatpush3.bf16.msra.mxu1 %v175_v62 }
 0x1eb   :  { %334 = vmatmul.mubr.msk.bf16.vlgmr.msra.gmra.mrb[0].mxu1 %vm40_vm0, %v365_v63 }
 0x2be   :  { %v335_v0 = vpop.f32.mrb[0].mxu1 }
 0x2bf   :  { %v243_v1 = vadd.f32 %v335_v0, %v411_v8  ;;  %v226_v2 = vpop.f32.mrb[1].mxu1 }
 0x2c0   :  { %v241_v3 = vadd.f32 %v226_v2, %v421_v12  ;;  %v336_v4 = vpop.f32.mrb[2].mxu1 }
 0x2c1   :  { %263 = vst.msk [vmem:[%s503_s3 + $0x10] sm:$0xff] %vm40_vm0, %v243_v1  ;;  %v244_v5 = vadd.f32 %v336_v4, %v425_v16  ;;  %v229_v6 = vpop.f32.mrb[3].mxu1 }
 0x2c2   :  { %261 = vst.msk [vmem:[%s503_s3] sm:$0xff] %vm40_vm0, %v241_v3  ;;  %v242_v7 = vadd.f32 %v229_v6, %v428_v17  ;;  %249 = vrot.lane.b32.xlu0 %v241_v3, %s371_s11 }
 0x2c3   :  { %264 = vst.msk [vmem:[%s503_s3 + $0x18] sm:$0xff] %vm40_vm0, %v244_v5 }
 0x2c4   :  { %262 = vst.msk [vmem:[%s503_s3 + $0x8] sm:$0xff] %vm40_vm0, %v242_v7  ;;  %251 = vrot.lane.b32.xlu1 %v242_v7, %s371_s11 }
 0x2c6   :  { %253 = vrot.lane.b32.xlu0 %v243_v1, %s371_s11 }
 0x2c8   :  { %255 = vrot.lane.b32.xlu1 %v244_v5, %s371_s11 }
 0x334   :  { %v250_v8 = vpop.permute.xlu0 %249 }
 0x335   :  { %265 = vst.msk [vmem:[%s503_s3 + $0x20] sm:$0xff] %vm40_vm0, %v250_v8 }
 0x336   :  { %v252_v9 = vpop.permute.xlu1 %251 }
 0x337   :  { %266 = vst.msk [vmem:[%s503_s3 + $0x28] sm:$0xff] %vm40_vm0, %v252_v9 }
 0x338   :  { %v254_v10 = vpop.permute.xlu0 %253 }
 0x339   :  { %267 = vst.msk [vmem:[%s503_s3 + $0x30] sm:$0xff] %vm40_vm0, %v254_v10 }
 0x33a   :  { %v256_v11 = vpop.permute.xlu1 %255 }
 0x33b   :  { %268 = vst.msk [vmem:[%s503_s3 + $0x38] sm:$0xff] %vm40_vm0, %v256_v11 }

</bundles_post_ra>
